<compile_context>
chip_gen: v5e
topology: v5e:2x2
jax: 0.10.0
libtpu: 0.0.40
codegen_flags: <defaults>
</compile_context>

<pallas_src>
import jax
import jax.numpy as jnp
from jax.experimental import pallas as pl
from jax.experimental.pallas import tpu as pltpu


_MAX_TILE_ROWS = 1024  # 512-1024-row blocks already hit ~85% of HBM roofline


def _softmax_kernel(x_ref, o_ref):
    # x_ref / o_ref: [TM, seqlen] VMEM tile of flattened attention-score rows.
    x = x_ref[...]
    m = jnp.max(x, axis=-1, keepdims=True)
    e = jnp.exp(x - m)                                             # stays in input dtype
    s = jnp.sum(e, axis=-1, keepdims=True, dtype=jnp.float32)      # single f32 accumulate path
    inv = pl.reciprocal(s, approx=True)                            # EUP vrcp, otherwise-idle slot
    o_ref[...] = (e * inv.astype(e.dtype)).astype(o_ref.dtype)


def _vmem_config():
    """(vmem_limit_bytes, per-step tile budget) per chip generation."""
    vmem_cap = None
    try:
        info = pltpu.get_tpu_info()
        vmem_cap = getattr(info, "vmem_capacity_bytes", None)
    except Exception:
        vmem_cap = None
    if vmem_cap is None or vmem_cap <= 96 * 1024 * 1024:
        # v7x (64 MiB VMEM/TC) or unknown: stay conservative; blocks beyond
        # ~1-2 MiB give no extra HBM-roofline benefit anyway.
        return 32 * 1024 * 1024, 8 * 1024 * 1024
    # v5e / v6e: 128 MiB physical VMEM.
    return 48 * 1024 * 1024, 20 * 1024 * 1024


def _sublane_multiple(dtype):
    itemsize = jnp.dtype(dtype).itemsize
    if itemsize >= 4:
        return 8
    if itemsize == 2:
        return 16
    return 32


def _pick_tile_rows(total_rows, seqlen, dtype, tile_budget_bytes):
    """Fixed row tile under the VMEM budget; no divisibility requirement."""
    itemsize = jnp.dtype(dtype).itemsize
    row_mult = _sublane_multiple(dtype)

    if total_rows < 2 * row_mult:
        # Tiny input: single full-extent block (satisfies the (8,128) rule as
        # the full array dim).
        return total_rows

    # Per grid step: double-buffered input + output blocks (~4x) plus ~2
    # tile-sized temporaries (x - m, e) in the input dtype.
    bytes_per_row = max(seqlen * itemsize * 6, 1)
    cap = tile_budget_bytes // bytes_per_row
    tm = min(_MAX_TILE_ROWS, cap)
    # Keep >= 2 grid steps so the "parallel" axis can shard across v7x's 2 TCs.
    tm = min(tm, (total_rows + 1) // 2)
    tm = tm - (tm % row_mult)
    return max(row_mult, tm)


def fast_softmax(x, batch, seqlen, heads, donate_input=False):
    """Softmax over the last (key) axis of [batch, heads, seqlen, seqlen] scores.

    Set donate_input=True only if the caller donates x (e.g. jit donate_argnums);
    otherwise aliasing would force XLA to copy the whole score tensor first.
    """
    orig_shape = x.shape
    assert orig_shape == (batch, heads, seqlen, seqlen), (orig_shape, batch, heads, seqlen)

    total_rows = batch * heads * seqlen
    x2 = x.reshape(total_rows, seqlen)

    vmem_limit, tile_budget = _vmem_config()
    tm = _pick_tile_rows(total_rows, seqlen, x.dtype, tile_budget)
    grid = (pl.cdiv(total_rows, tm),)

    extra = {}
    if donate_input:
        extra["input_output_aliases"] = {0: 0}

    out = pl.pallas_call(
        _softmax_kernel,
        out_shape=jax.ShapeDtypeStruct((total_rows, seqlen), x.dtype),
        grid_spec=pltpu.PrefetchScalarGridSpec(
            num_scalar_prefetch=0,
            grid=grid,
            in_specs=[pl.BlockSpec((tm, seqlen), lambda i: (i, 0))],
            out_specs=pl.BlockSpec((tm, seqlen), lambda i: (i, 0)),
        ),
        compiler_params=pltpu.CompilerParams(
            dimension_semantics=("parallel",),
            vmem_limit_bytes=vmem_limit,
        ),
        **extra,
    )(x2)

    return out.reshape(orig_shape)


if __name__ == "__main__":
    # Small, deterministic example consistent with BERT attention scores.
    # (Real BERT uses seqlen in {128, 384, 512}; seqlen=16 is only a demo size.)
    batch, heads, seqlen = 2, 4, 16
    key = jax.random.PRNGKey(0)
    x = jax.random.normal(key, (batch, heads, seqlen, seqlen), dtype=jnp.float32)

    y_ref = jax.nn.softmax(x, axis=-1)

    y = fast_softmax(x, batch, seqlen, heads)
    y = jax.block_until_ready(y)

    assert y.shape == x.shape and y.dtype == x.dtype
    # approx=True reciprocal: loosen tolerances vs the exact reference.
    assert jnp.allclose(y, y_ref, atol=5e-3, rtol=5e-3)
    assert jnp.allclose(jnp.sum(y, axis=-1), 1.0, atol=5e-3)

    print("KERNEL_OK")
</pallas_src>

<mosaic_0001>
module attributes {stable_mosaic.version = 11 : i64} {
  func.func @_softmax_kernel(%arg0: i32, %arg1: memref<64x16xf32, #tpu.memory_space<vmem>>, %arg2: memref<64x16xf32, #tpu.memory_space<vmem>>) attributes {dimension_semantics = [#tpu.dimension_semantics<parallel>], iteration_bounds = array<i64: 2>, scalar_prefetch = 0 : i64, scratch_operands = 0 : i64, tpu.core_type = #tpu.core_type<tc>, window_params = [{transform_indices = @transform_0, window_bounds = array<i64: 64, 16>}, {transform_indices = @transform_1, window_bounds = array<i64: 64, 16>}]} {
    %c0 = arith.constant 0 : index
    %c0_0 = arith.constant 0 : index
    %0 = vector.load %arg1[%c0, %c0_0] : memref<64x16xf32, #tpu.memory_space<vmem>>, vector<64x16xf32>
    %cst = arith.constant dense<0xFF800000> : vector<64xf32>
    %1 = vector.multi_reduction <maximumf>, %0, %cst [1] : vector<64x16xf32> to vector<64xf32>
    %2 = vector.shape_cast %1 : vector<64xf32> to vector<64x1xf32>
    %3 = vector.broadcast %2 : vector<64x1xf32> to vector<64x16xf32>
    %4 = arith.subf %0, %3 : vector<64x16xf32>
    %5 = math.exp %4 : vector<64x16xf32>
    %cst_1 = arith.constant dense<0.000000e+00> : vector<64xf32>
    %6 = vector.multi_reduction <add>, %5, %cst_1 [1] : vector<64x16xf32> to vector<64xf32>
    %7 = vector.shape_cast %6 : vector<64xf32> to vector<64x1xf32>
    %8 = tpu.reciprocal %7 {approx = true} : vector<64x1xf32> -> vector<64x1xf32>
    %9 = vector.broadcast %8 : vector<64x1xf32> to vector<64x16xf32>
    %10 = arith.mulf %5, %9 : vector<64x16xf32>
    %c0_2 = arith.constant 0 : index
    %c0_3 = arith.constant 0 : index
    %11 = vector.load %arg2[%c0_2, %c0_3] : memref<64x16xf32, #tpu.memory_space<vmem>>, vector<64x16xf32>
    tpu.vector_store %arg2[%c0_2, %c0_3], %10 {strides = array<i32>} : memref<64x16xf32, #tpu.memory_space<vmem>>, vector<64x16xf32>,
    return
  }
  func.func @transform_0(%arg0: i32) -> (i32, i32) {
    %c0_i32 = arith.constant 0 : i32
    %c0_i32_0 = arith.constant 0 : i32
    return %arg0, %c0_i32 : i32, i32
  }
  func.func @transform_1(%arg0: i32) -> (i32, i32) {
    %c0_i32 = arith.constant 0 : i32
    %c0_i32_0 = arith.constant 0 : i32
    return %arg0, %c0_i32 : i32, i32
  }
}

</mosaic_0001>

<bundles_post_ra>
// kernel: tpu_custom_call.1
= control target key start
LH: loop header
LB: loop body
LE: loop exit
PB: predicated region body
PF: predicated region fallthrough
CT: control target
= control target key end

     0   :  { %s350_s6 = smov 0   ;;  %s408_s0 = inlined_call_operand.vmem [shape: f32[128,16], index: 0, kind: input, shape index: {}]   ;;  %s409_s1 = inlined_call_operand.vmem [shape: f32[128,16], index: 1, kind: output, shape index: {}]  }
   0x1 LB: > { %s281_s7 = sadd.s32 4294967295, %s338_s6   ;;  %p285_p0 = scmp.ge.s32.totalorder %s338_s6, 1  ;;  %s338_s6 = sphi %s350_s6, %s11_s6  }
   0x2   : > { %p88_p1 = scmp.lt.s32.totalorder %s338_s6, 3 }
   0x4   : > { %p89_p2 = pnand %p285_p0, %p88_p1 }
   0x5   : > { %s286_s8 = sshll.u32 (!%p89_p2), %s281_s7, 3 }
   0x6   : > { %92 = sbr.rel (%p89_p2) target bundleno = 296 (0x128), region = 24  ;;  %p109_p3 = scmp.lt.s32.totalorder (!%p89_p2), %s286_s8, 15 }
   0xb   : > { %s411_s8 = smov (!%p109_p3, %s286_s8), 15  ;;  %vm128_vm0 = vcmask 130048  }
   0xc   : > { %s287_s9 = sshll.u32 %s411_s8, 3 }
   0xd   : > { %s112_s12 = scalar_lea.vmem %s408_s0, %s287_s9  ;;  %s387_s15 = scalar_lea.vmem %s409_s1, %s287_s9 }
   0xe   : > { %v124_v0 = vld [vmem:[%s112_s12 + $0x20] sm:$0xff]  ;;  %v122_v1 = vld [vmem:[%s112_s12 + $0x10] sm:$0xff]  ;;  %v125_v6 = vld [vmem:[%s112_s12 + $0x28] sm:$0xff] }
   0xf   : > { %v120_v2 = vld [vmem:[%s112_s12] sm:$0xff]  ;;  %v141_v3 = vsel %vm128_vm0, %v124_v0, -inf  ;;  %v135_v4 = vsel %vm128_vm0, %v122_v1, -inf  ;;  %v123_v7 = vld [vmem:[%s112_s12 + $0x18] sm:$0xff]  ;;  %v121_v8 = vld [vmem:[%s112_s12 + $0x8] sm:$0xff]  ;;  %v144_v9 = vsel %vm128_vm0, %v125_v6, -inf }
  0x10   : > { %v129_v5 = vsel %vm128_vm0, %v120_v2, -inf  ;;  %142 = vmax.xlane.f32.xlu2 %v141_v3  ;;  %136 = vmax.xlane.f32.xlu1 %v135_v4  ;;  %v138_v10 = vsel %vm128_vm0, %v123_v7, -inf  ;;  %v132_v11 = vsel %vm128_vm0, %v121_v8, -inf  ;;  %v127_v12 = vld [vmem:[%s112_s12 + $0x38] sm:$0xff]  ;;  %v126_v13 = vld [vmem:[%s112_s12 + $0x30] sm:$0xff] }
  0x11   : > { %130 = vmax.xlane.f32.xlu0 %v129_v5  ;;  %v150_v14 = vsel %vm128_vm0, %v127_v12, -inf  ;;  %v147_v15 = vsel %vm128_vm0, %v126_v13, -inf }
  0x18   : > { %145 = vmax.xlane.f32.xlu2 %v144_v9  ;;  %139 = vmax.xlane.f32.xlu1 %v138_v10 }
  0x19   : > { %133 = vmax.xlane.f32.xlu0 %v132_v11 }
  0x20   : > { %151 = vmax.xlane.f32.xlu1 %v150_v14 }
  0x21   : > { %148 = vmax.xlane.f32.xlu0 %v147_v15 }
  0x83   : > { %v143_v16 = vpop.xlane.xlu2 %142  ;;  %v137_v17 = vpop.xlane.xlu1 %136 }
  0x84   : > { %v155_v18 = vsub.f32 %v122_v1, %v137_v17  ;;  %v131_v19 = vpop.xlane.xlu0 %130  ;;  %v157_v29 = vsub.f32 %v124_v0, %v143_v16 }
  0x85   : > { %v153_v20 = vsub.f32 %v120_v2, %v131_v19 }
  0x86   : > { %v165_v21 = vmul.f32 1.442695, %v155_v18  ;;  %v169_v37 = vmul.f32 1.442695, %v157_v29 }
  0x87   : > { %v161_v22 = vmul.f32 1.442695, %v153_v20 }
  0x88   : > { %300 = vpow2.f32 %v165_v21 }
  0x89   : > { %302 = vpow2.f32 %v161_v22 }
  0x8b   : > { %v146_v23 = vpop.xlane.xlu2 %145  ;;  %v140_v24 = vpop.xlane.xlu1 %139 }
  0x8c   : > { %v158_v25 = vsub.f32 %v125_v6, %v146_v23  ;;  %v156_v26 = vsub.f32 %v123_v7, %v140_v24  ;;  %v134_v27 = vpop.xlane.xlu0 %133 }
  0x8d   : > { %v154_v28 = vsub.f32 %v121_v8, %v134_v27 }
  0x8e   : > { %v171_v30 = vmul.f32 1.442695, %v158_v25  ;;  %v167_v31 = vmul.f32 1.442695, %v156_v26  ;;  %v301_v32 = vpop.eup %300 }
  0x8f   : > { %v163_v33 = vmul.f32 1.442695, %v154_v28  ;;  %v303_v34 = vpop.eup %302  ;;  %v183_v35 = vsel %vm128_vm0, %v301_v32, 0.0 }
  0x90   : > { %304 = vpow2.f32 %v171_v30  ;;  %184 = vadd.xlane.f32.xlu1 %v183_v35  ;;  %v177_v36 = vsel %vm128_vm0, %v303_v34, 0.0 }
  0x91   : > { %306 = vpow2.f32 %v167_v31  ;;  %178 = vadd.xlane.f32.xlu2 %v177_v36 }
  0x92   : > { %308 = vpow2.f32 %v163_v33 }
  0x93   : > { %v152_v38 = vpop.xlane.xlu1 %151  ;;  %310 = vpow2.f32 %v169_v37 }
  0x94   : > { %v149_v39 = vpop.xlane.xlu0 %148  ;;  %v160_v42 = vsub.f32 %v127_v12, %v152_v38 }
  0x95   : > { %v159_v40 = vsub.f32 %v126_v13, %v149_v39 }
  0x96   : > { %v305_v41 = vpop.eup %304  ;;  %v175_v49 = vmul.f32 1.442695, %v160_v42 }
  0x97   : > { %v307_v43 = vpop.eup %306  ;;  %v173_v44 = vmul.f32 1.442695, %v159_v40  ;;  %v192_v45 = vsel %vm128_vm0, %v305_v41, 0.0 }
  0x98   : > { %v309_v46 = vpop.eup %308  ;;  %v186_v47 = vsel %vm128_vm0, %v307_v43, 0.0  ;;  %193 = vadd.xlane.f32.xlu1 %v192_v45 }
  0x99   : > { %312 = vpow2.f32 %v173_v44  ;;  %v180_v48 = vsel %vm128_vm0, %v309_v46, 0.0  ;;  %187 = vadd.xlane.f32.xlu2 %v186_v47  ;;  %v311_v50 = vpop.eup %310 }
  0x9a   : > { %181 = vadd.xlane.f32.xlu0 %v180_v48  ;;  %314 = vpow2.f32 %v175_v49  ;;  %v189_v52 = vsel %vm128_vm0, %v311_v50, 0.0 }
  0x9f   : > { %v313_v51 = vpop.eup %312 }
  0xa0   : > { %v195_v53 = vsel %vm128_vm0, %v313_v51, 0.0  ;;  %v315_v54 = vpop.eup %314 }
  0xa1   : > { %196 = vadd.xlane.f32.xlu2 %v195_v53  ;;  %v198_v55 = vsel %vm128_vm0, %v315_v54, 0.0 }
  0xa2   : > { %190 = vadd.xlane.f32.xlu0 %v189_v52 }
  0xaa   : > { %199 = vadd.xlane.f32.xlu0 %v198_v55 }
 0x103   : > { %v185_v56 = vpop.xlane.xlu1 %184 }
 0x104   : > { %316 = vrcp.f32 %v185_v56  ;;  %v179_v57 = vpop.xlane.xlu2 %178 }
 0x105   : > { %318 = vrcp.f32 %v179_v57 }
 0x10a   : > { %v317_v58 = vpop.eup %316 }
 0x10b   : > { %v319_v59 = vpop.eup %318  ;;  %v211_v60 = vmul.f32 %v317_v58, %v301_v32  ;;  %v194_v61 = vpop.xlane.xlu1 %193 }
 0x10c   : > { %v209_v62 = vmul.f32 %v319_v59, %v303_v34  ;;  %320 = vrcp.f32 %v194_v61  ;;  %v188_v63 = vpop.xlane.xlu2 %187 }
 0x10d   : > { %v182_v0 = vpop.xlane.xlu0 %181  ;;  %219 = vst.msk [vmem:[%s387_s15 + $0x10] sm:$0xff] %vm128_vm0, %v211_v60  ;;  %322 = vrcp.f32 %v188_v63 }
 0x10e   : > { %217 = vst.msk [vmem:[%s387_s15] sm:$0xff] %vm128_vm0, %v209_v62  ;;  %324 = vrcp.f32 %v182_v0 }
 0x112   : > { %v321_v1 = vpop.eup %320 }
 0x113   : > { %v323_v2 = vpop.eup %322  ;;  %v214_v3 = vmul.f32 %v321_v1, %v305_v41 }
 0x114   : > { %v325_v4 = vpop.eup %324  ;;  %v212_v5 = vmul.f32 %v323_v2, %v307_v43  ;;  %v197_v6 = vpop.xlane.xlu2 %196 }
 0x115   : > { %v191_v7 = vpop.xlane.xlu0 %190  ;;  %222 = vst.msk [vmem:[%s387_s15 + $0x28] sm:$0xff] %vm128_vm0, %v214_v3  ;;  %v210_v8 = vmul.f32 %v325_v4, %v309_v46  ;;  %326 = vrcp.f32 %v197_v6 }
 0x116   : > { %220 = vst.msk [vmem:[%s387_s15 + $0x18] sm:$0xff] %vm128_vm0, %v212_v5  ;;  %328 = vrcp.f32 %v191_v7 }
 0x117   : > { %218 = vst.msk [vmem:[%s387_s15 + $0x8] sm:$0xff] %vm128_vm0, %v210_v8 }
 0x11b   : > { %v327_v9 = vpop.eup %326 }
 0x11c   : > { %v329_v10 = vpop.eup %328  ;;  %v215_v11 = vmul.f32 %v327_v9, %v313_v51 }
 0x11d   : > { %v200_v12 = vpop.xlane.xlu0 %199  ;;  %v213_v13 = vmul.f32 %v329_v10, %v311_v50 }
 0x11e   : > { %330 = vrcp.f32 %v200_v12  ;;  %223 = vst.msk [vmem:[%s387_s15 + $0x30] sm:$0xff] %vm128_vm0, %v215_v11 }
 0x11f   : > { %221 = vst.msk [vmem:[%s387_s15 + $0x20] sm:$0xff] %vm128_vm0, %v213_v13 }
 0x124   : > { %v331_v14 = vpop.eup %330 }
 0x125   : > { %v216_v15 = vmul.f32 %v331_v14, %v315_v54 }
 0x127   : > { %224 = vst.msk [vmem:[%s387_s15 + $0x38] sm:$0xff] %vm128_vm0, %v216_v15 }
 0x128 PF: > { %s11_s6 = sadd.s32 1, %s338_s6  }
 0x129   : > { %p8_p4 = scmp.ge.s32.totalorder %s11_s6, 4  }
 0x12b   :  { %10 = sbr.rel (!%p8_p4) target bundleno = 1 (0x1), region = 54 }

</bundles_post_ra>
